<compile_context>
chip_gen: v5e
topology: v5e:2x2
jax: 0.10.0
libtpu: 0.0.40
codegen_flags: <defaults>
</compile_context>

<pallas_src>
import jax
import jax.numpy as jnp
from jax.experimental import pallas as pl
from jax.experimental.pallas import tpu as pltpu


_ROLL_IS_NEXT = None  # cached: True -> pltpu.roll(x, n-1, axis=-1)[j] == x[(j+1) % n]


def _roll_is_next() -> bool:
    """Probe pltpu.roll's rotation convention once (tiny one-off kernel)."""
    global _ROLL_IS_NEXT
    if _ROLL_IS_NEXT is None:
        def probe(x_ref, o_ref):
            o_ref[...] = pltpu.roll(x_ref[...], 127, axis=1)

        with jax.ensure_compile_time_eval():
            x = jnp.broadcast_to(jnp.arange(128, dtype=jnp.float32), (8, 128))
            y = pl.pallas_call(
                probe, out_shape=jax.ShapeDtypeStruct((8, 128), jnp.float32))(x)
            _ROLL_IS_NEXT = bool(jax.device_get(y)[0, 0] == 1.0)
    return _ROLL_IS_NEXT


def _make_kernel(square: bool, bs: int, nc: int, shift_dx: int, shift_dy: int):
    def penalty(d):
        # l2: square the raw difference directly (d*d == |d|^2).
        return d * d if square else jnp.abs(d)

    needs_tail_mask = (nc % bs) != 0

    def kernel(x_ref, mask_ref, out_ref):
        x = x_ref[...].astype(jnp.float32)            # (bs, L), lane-dense

        if needs_tail_mask:
            # Zero invalid slice-rows of the (padded) tail block; the rolls act
            # per flattened row, so zeroed rows contribute exactly 0.
            row = jax.lax.broadcasted_iota(jnp.int32, x.shape, 0)
            x = jnp.where(row + pl.program_id(0) * bs < nc, x, 0.0)

        m = mask_ref[...]                             # (2, L) f32 {0,1}

        # dx: +-1 neighbour along the flattened axis, masked to pairs that stay
        # inside the same image row (mask row 0).
        x_r = pltpu.roll(x, shift_dx, axis=1)
        sdx = jnp.sum(penalty(x_r - x) * m[0:1, :])

        # dy: +-W neighbour along the flattened axis, masked to pairs whose
        # neighbour row exists (mask row 1).
        x_d = pltpu.roll(x, shift_dy, axis=1)
        sdy = jnp.sum(penalty(x_d - x) * m[1:2, :])

        # Lane-dense per-block partial-sum tile: sublane 0 = dx, sublane 1 = dy.
        sub = jax.lax.broadcasted_iota(jnp.int32, (8, 128), 0)
        out_ref[0] = jnp.where(sub == 0, sdx, jnp.where(sub == 1, sdy, 0.0))

    return kernel


def gradient_loss(s, penalty: str = 'l2'):
    """Pallas implementation of the PyTorch gradient_loss.forward (NCHW)."""
    n, c, h, w = s.shape
    nc = n * c
    L = h * w

    # Lane-dense view: each (H, W) image becomes one contiguous row of H*W
    # elements (free reshape of a contiguous NCHW array).  Keeps every 128-lane
    # vreg fully populated for W << 128 and the HBM->VMEM DMA fully contiguous.
    x = s.reshape(nc, L)

    # ~4 MiB of f32 working data per grid step; the fused masked reduction keeps
    # peak VMEM well inside the 48 MiB budget on all of v5e/v6e/v7x.
    target_f32_bytes = 4 << 20
    bs = max(1, target_f32_bytes // (L * 4))
    if bs >= nc:
        bs = nc                              # block equals the full slice axis
    else:
        bs = max(8, (bs // 8) * 8)           # sublane rule when tiled
        if bs >= nc:
            bs = nc
    num_blocks = pl.cdiv(nc, bs)

    # {0,1} validity patterns for the flat +-1 (dx) and +-W (dy) neighbour
    # pairs, written for whichever rotation convention pltpu.roll uses.
    roll_next = _roll_is_next()
    col = jnp.arange(L, dtype=jnp.int32)
    if roll_next:        # rolled[j] == x[(j+1) % L] / x[(j+w) % L]
        dx_valid = (col % w) < (w - 1)
        dy_valid = col < (h - 1) * w
    else:                # rolled[j] == x[(j-1) % L] / x[(j-w) % L]
        dx_valid = (col % w) > 0
        dy_valid = col >= w
    masks = jnp.stack([dx_valid, dy_valid]).astype(jnp.float32)   # (2, L)

    kernel = _make_kernel(penalty == 'l2', bs, nc,
                          shift_dx=L - 1, shift_dy=L - w)

    partials = pl.pallas_call(
        kernel,
        out_shape=jax.ShapeDtypeStruct((num_blocks, 8, 128), jnp.float32),
        grid_spec=pltpu.PrefetchScalarGridSpec(
            num_scalar_prefetch=0,
            grid=(num_blocks,),
            in_specs=[
                # (bs, L): last dim equals the full array dim; bs is a multiple
                # of 8 or the full slice count -> (8,128) rule satisfied.
                pl.BlockSpec((bs, L), lambda i: (i, 0)),
                # Constant validity pattern: same block every step, so the
                # pipeline can keep re-using it without re-fetching.
                pl.BlockSpec((2, L), lambda i: (0, 0)),
            ],
            out_specs=pl.BlockSpec((1, 8, 128), lambda i: (i, 0, 0)),
        ),
        compiler_params=pltpu.CompilerParams(
            dimension_semantics=("parallel",),
            vmem_limit_bytes=48 * 1024 * 1024,
        ),
        cost_estimate=pl.CostEstimate(
            flops=6 * nc * L,
            transcendentals=0,
            bytes_accessed=nc * L * s.dtype.itemsize + 2 * L * 4
            + num_blocks * 8 * 128 * 4,
        ),
    )(x, masks)

    # Tiny final reduction over the per-block partials.
    sdx = jnp.sum(partials[:, 0, 0])
    sdy = jnp.sum(partials[:, 1, 0])

    # Mean denominators match torch.mean over dx=(N,C,H,W-1), dy=(N,C,H-1,W).
    # (h==1 or w==1 gives 0/0 -> nan, same degenerate behaviour as torch.)
    mean_dx = sdx / jnp.float32(nc * h * (w - 1))
    mean_dy = sdy / jnp.float32(nc * (h - 1) * w)
    return (mean_dx + mean_dy) / 2.0


def gradient_loss_ref(s, penalty: str = 'l2'):
    """Pure-JAX reference mirroring the PyTorch module exactly."""
    dy = jnp.abs(s[:, :, 1:, :] - s[:, :, :-1, :])
    dx = jnp.abs(s[:, :, :, 1:] - s[:, :, :, :-1])
    if penalty == 'l2':
        dy = dy * dy
        dx = dx * dx
    return (jnp.mean(dx) + jnp.mean(dy)) / 2.0


if __name__ == "__main__":
    key = jax.random.PRNGKey(0)
    # Small NCHW input consistent with the module's forward.
    s = jax.random.normal(key, (2, 4, 16, 16), dtype=jnp.float32)

    out_l2 = jax.block_until_ready(gradient_loss(s, penalty='l2'))
    ref_l2 = gradient_loss_ref(s, penalty='l2')
    assert jnp.allclose(out_l2, ref_l2, rtol=1e-4, atol=1e-5), (out_l2, ref_l2)

    out_l1 = jax.block_until_ready(gradient_loss(s, penalty='l1'))
    ref_l1 = gradient_loss_ref(s, penalty='l1')
    assert jnp.allclose(out_l1, ref_l1, rtol=1e-4, atol=1e-5), (out_l1, ref_l1)

    print("KERNEL_OK")
</pallas_src>

<mosaic_0001>
module attributes {stable_mosaic.version = 11 : i64} {
  func.func @probe(%arg0: memref<8x128xf32, #tpu.memory_space<vmem>>, %arg1: memref<8x128xf32, #tpu.memory_space<vmem>>) attributes {dimension_semantics = [], scalar_prefetch = 0 : i64, scratch_operands = 0 : i64, tpu.core_type = #tpu.core_type<tc>} {
    %c0 = arith.constant 0 : index
    %c0_0 = arith.constant 0 : index
    %0 = vector.load %arg0[%c0, %c0_0] : memref<8x128xf32, #tpu.memory_space<vmem>>, vector<8x128xf32>
    %c127_i32 = arith.constant 127 : i32
    %1 = tpu.dynamic_rotate %0 by %c127_i32 dim 1 : vector<8x128xf32>, i32 -> vector<8x128xf32>
    %c0_1 = arith.constant 0 : index
    %c0_2 = arith.constant 0 : index
    %2 = vector.load %arg1[%c0_1, %c0_2] : memref<8x128xf32, #tpu.memory_space<vmem>>, vector<8x128xf32>
    tpu.vector_store %arg1[%c0_1, %c0_2], %1 {strides = array<i32>} : memref<8x128xf32, #tpu.memory_space<vmem>>, vector<8x128xf32>,
    return
  }
}

</mosaic_0001>

<bundles_post_ra>
// kernel: tpu_custom_call.1
= control target key start
LH: loop header
LB: loop body
LE: loop exit
PB: predicated region body
PF: predicated region fallthrough
CT: control target
= control target key end

     0   :  { %6 = vsyncpa [#allocation3], 0  ;;  %s118_s0 = inlined_call_operand.hbm [shape: f32[8,128], index: 0, kind: input, shape index: {}]   ;;  %s119_s1 = inlined_call_operand.hbm [shape: f32[8,128], index: 1, kind: output, shape index: {}]  }
   0x1   :  { %7 = vsyncpa [#allocation4], 0  ;;  %s13_s8 = sshll.u32 %s118_s0, 4  ;;  %s99_s9 = smov [#allocation2]   ;;  %s14_s8 = int_to_ptr.hbm [resolvable:$true] %s13_s8 }
   0x2   :  { %s15_s10 = sshll.u32 %s99_s9, 4  ;;  %s16_s10 = int_to_ptr.vmem [resolvable:$true] %s15_s10 }
   0x3   :  { %18 = dma.hbm_to_vmem [thread:$0]  %s14_s8, 128, %s16_s10, [#allocation3]  }
   0x4   :  { %95 = dma.done.wait [#allocation3], 128  }
   0x5   :  { %96 = vsyncadd [#allocation3], 4294967168  ;;  %v23_v0 = vld [vmem:[#allocation2] sm:$0xff]  ;;  %s100_s11 = smov 127   ;;  %s101_s12 = smov [#allocation5]  }
   0x6   :  { %24 = vrot.lane.b32.xlu0 %v23_v0, %s100_s11  ;;  %s32_s13 = sshll.u32 %s101_s12, 4  ;;  %s34_s16 = sshll.u32 %s119_s1, 4  ;;  %s33_s13 = int_to_ptr.vmem [resolvable:$true] %s32_s13  ;;  %s35_s16 = int_to_ptr.hbm [resolvable:$true] %s34_s16 }
  0x78   :  { %v25_v1 = vpop.permute.xlu0 %24 }
  0x79   :  { %26 = vst [vmem:[#allocation5] sm:$0xff] %v25_v1 }
  0x7a   :  { %37 = dma.vmem_to_hbm [thread:$0]  %s33_s13, 128, %s35_s16, [#allocation4]  }
  0x7b   :  { %97 = dma.done.wait [#allocation4], 128  }
  0x7c   :  { %98 = vsyncadd [#allocation4], 4294967168 }
  0x7d   :  { %42 = vsyncpa [#allocation3], 1 }
  0x7e   :  { %43 = vsyncpa [#allocation4], 1 }

</bundles_post_ra>
